<compile_context>
chip_gen: v5e
topology: v5e:2x2
jax: 0.10.0
libtpu: 0.0.40
codegen_flags: <defaults>
</compile_context>

<pallas_src>
import functools
import math

import jax
import jax.numpy as jnp
from jax import lax
from jax.experimental import pallas as pl
from jax.experimental.pallas import tpu as pltpu


def _round_up(x, m):
    return (x + m - 1) // m * m


def _pick_tile(t, preferred=(256, 128, 64, 32, 16, 8)):
    for cand in preferred:
        if cand <= t and t % cand == 0:
            return cand
    return t


# -----------------------------------------------------------------------------
# Kernel 1: fused, head-padded Q/K/V projection.
#   x (TT, C) @ W_qkv (C, 3*Hp)  ->  q, k, v tiles (TT, Hp)
# Inputs are fed to the MXU in their native dtype (bf16 stays bf16) with f32
# accumulation. The 1/sqrt(C) attention scale is folded into q here: O(T*H)
# multiplies instead of an O(T*T) pass over the score matrix.
# -----------------------------------------------------------------------------
def qkv_proj_kernel(x_ref, w_ref, q_ref, k_ref, v_ref, *, hp, scale):
    x = x_ref[...]                                              # (TT, C)
    w = w_ref[...]                                              # (C, 3*Hp)
    qkv = jnp.dot(x, w, preferred_element_type=jnp.float32)     # (TT, 3*Hp) f32
    # Slices land on 128-lane tile boundaries (hp is a multiple of 128).
    q_ref[...] = (qkv[:, 0 * hp:1 * hp] * scale).astype(q_ref.dtype)
    k_ref[...] = qkv[:, 1 * hp:2 * hp].astype(k_ref.dtype)
    v_ref[...] = qkv[:, 2 * hp:3 * hp].astype(v_ref.dtype)


# -----------------------------------------------------------------------------
# Kernel 2: causal flash attention, online softmax.
# grid = (B, T//TQ, T//TKV); kv axis is last and "arbitrary"; m/l/acc live in
# VMEM scratch, output written once on the last kv step (P3 pattern).
# -----------------------------------------------------------------------------
def flash_attn_kernel(q_ref, k_ref, v_ref, o_ref, m_sc, l_sc, acc_sc,
                      *, block_q, block_kv):
    qi = pl.program_id(1)
    ki = pl.program_id(2)

    @pl.when(ki == 0)
    def _init():
        m_sc[...] = jnp.full_like(m_sc, -jnp.inf)
        l_sc[...] = jnp.zeros_like(l_sc)
        acc_sc[...] = jnp.zeros_like(acc_sc)

    q_start = qi * block_q
    k_start = ki * block_kv

    # Skip kv blocks entirely above the causal diagonal (no compute, sems keep
    # the pipeline consistent; the diagonal block always has unmasked entries
    # so m/l never stay at -inf/0 for any query row).
    @pl.when(k_start <= q_start + block_q - 1)
    def _update():
        q = q_ref[...]                                          # (TQ, Hp)
        k = k_ref[...]                                          # (TKV, Hp)
        # q @ k^T contracting directly on the head axis: no explicit transpose
        # of k is materialized (MXU fed straight from the tile).
        s = lax.dot_general(q, k, (((1,), (1,)), ((), ())),
                            preferred_element_type=jnp.float32)  # (TQ, TKV)
        row = q_start + lax.broadcasted_iota(jnp.int32, (block_q, block_kv), 0)
        col = k_start + lax.broadcasted_iota(jnp.int32, (block_q, block_kv), 1)
        s = jnp.where(row >= col, s, -jnp.inf)

        m_prev = m_sc[...]
        m_new = jnp.maximum(m_prev, s.max(axis=-1, keepdims=True))
        alpha = jnp.exp(m_prev - m_new)
        p = jnp.exp(s - m_new)
        l_sc[...] = alpha * l_sc[...] + p.sum(axis=-1, keepdims=True)
        acc_sc[...] = alpha * acc_sc[...] + jnp.dot(
            p.astype(v_ref.dtype), v_ref[...],
            preferred_element_type=jnp.float32)
        m_sc[...] = m_new

    @pl.when(ki == pl.num_programs(2) - 1)
    def _finalize():
        # TODO(synk): nn.Dropout(0.2) on the attention weights omitted —
        # eval-mode semantics (identity).
        inv_l = pl.reciprocal(l_sc[...], approx=True)   # EUP slot, ~free
        o_ref[...] = (acc_sc[...] * inv_l).astype(o_ref.dtype)


def head_forward(x, w_key, w_query, w_value, *, block_q=None, block_kv=None):
    """x: (B, T, C); w_*: (head_size, n_embed) in PyTorch nn.Linear layout."""
    B, T, C = x.shape
    H = w_key.shape[0]
    Hp = max(128, _round_up(H, 128))          # lane-dense head dim
    dtype = x.dtype

    if block_q is None:
        block_q = _pick_tile(T)
    if block_kv is None:
        block_kv = _pick_tile(T)
    assert T % block_q == 0 and T % block_kv == 0

    scale = float(C) ** -0.5                  # n_embed scaling, as in the module

    def pad_wt(w):                            # (H, C) -> (C, Hp), zero-padded
        return jnp.pad(w.T.astype(dtype), ((0, 0), (0, Hp - H)))

    w_qkv = jnp.concatenate(
        [pad_wt(w_query), pad_wt(w_key), pad_wt(w_value)], axis=1)   # (C, 3*Hp)

    itemsize = jnp.dtype(dtype).itemsize
    vmem_limit = 48 * 1024 * 1024             # safe on v7x (64 MiB) and v5e/v6e

    # --- Q/K/V projections: separate call so they are computed exactly once
    # per token, not once per (q-tile, kv-tile) pair of the attention grid. ---
    proj_cost = pl.CostEstimate(
        flops=2 * B * T * C * 3 * Hp,
        transcendentals=0,
        bytes_accessed=(x.size + w_qkv.size + 3 * B * T * Hp) * itemsize)
    qkv_shape = jax.ShapeDtypeStruct((B, T, Hp), dtype)
    q, k, v = pl.pallas_call(
        functools.partial(qkv_proj_kernel, hp=Hp, scale=scale),
        out_shape=(qkv_shape, qkv_shape, qkv_shape),
        grid_spec=pltpu.PrefetchScalarGridSpec(
            num_scalar_prefetch=0,
            grid=(B, T // block_q),
            in_specs=[
                pl.BlockSpec((pl.Squeezed(), block_q, C),
                             lambda b, t: (b, t, 0)),
                pl.BlockSpec((C, 3 * Hp), lambda b, t: (0, 0)),
            ],
            out_specs=tuple(
                pl.BlockSpec((pl.Squeezed(), block_q, Hp),
                             lambda b, t: (b, t, 0))
                for _ in range(3)),
        ),
        compiler_params=pltpu.CompilerParams(
            dimension_semantics=("parallel", "parallel"),
            vmem_limit_bytes=vmem_limit),
        cost_estimate=proj_cost,
    )(x, w_qkv)

    # --- flash attention over (B, q-tiles, kv-tiles) --------------------------
    attn_cost = pl.CostEstimate(
        flops=4 * B * T * T * Hp,
        transcendentals=B * T * T,
        bytes_accessed=4 * B * T * Hp * itemsize)
    o = pl.pallas_call(
        functools.partial(flash_attn_kernel,
                          block_q=block_q, block_kv=block_kv),
        out_shape=jax.ShapeDtypeStruct((B, T, Hp), dtype),
        grid_spec=pltpu.PrefetchScalarGridSpec(
            num_scalar_prefetch=0,
            grid=(B, T // block_q, T // block_kv),
            in_specs=[
                pl.BlockSpec((pl.Squeezed(), block_q, Hp),
                             lambda b, qi, ki: (b, qi, 0)),
                pl.BlockSpec((pl.Squeezed(), block_kv, Hp),
                             lambda b, qi, ki: (b, ki, 0)),
                pl.BlockSpec((pl.Squeezed(), block_kv, Hp),
                             lambda b, qi, ki: (b, ki, 0)),
            ],
            out_specs=pl.BlockSpec((pl.Squeezed(), block_q, Hp),
                                   lambda b, qi, ki: (b, qi, 0)),
            scratch_shapes=[
                pltpu.VMEM((block_q, 1), jnp.float32),    # running max m
                pltpu.VMEM((block_q, 1), jnp.float32),    # running denom l
                pltpu.VMEM((block_q, Hp), jnp.float32),   # output accumulator
            ],
        ),
        compiler_params=pltpu.CompilerParams(
            # B and q-tile axes parallel -> both v7x TensorCores get work even
            # at small B; kv (reduction) axis is last and arbitrary.
            dimension_semantics=("parallel", "parallel", "arbitrary"),
            vmem_limit_bytes=vmem_limit),
        cost_estimate=attn_cost,
    )(q, k, v)

    # Drop the zero-padded head lanes (kernel-side stores stay lane-dense).
    return o[..., :H]


def reference_forward(x, w_key, w_query, w_value):
    """Pure-JAX reference matching the PyTorch module (eval mode)."""
    B, T, C = x.shape
    k = x @ w_key.T
    q = x @ w_query.T
    v = x @ w_value.T
    wei = (q @ jnp.swapaxes(k, -2, -1)) * (C ** -0.5)
    tril = jnp.tril(jnp.ones((T, T), dtype=bool))
    wei = jnp.where(tril, wei, -jnp.inf)
    wei = jax.nn.softmax(wei, axis=-1)
    return wei @ v


if __name__ == "__main__":
    # Small shapes consistent with the module's forward (B, T, n_embed).
    # T=16 with 8x8 tiles exercises the multi-block online softmax and the
    # causal block-skip path.
    B, T, n_embed, head_size = 2, 16, 32, 16

    key = jax.random.PRNGKey(0)
    kx, kk, kq, kv = jax.random.split(key, 4)

    x = jax.random.normal(kx, (B, T, n_embed), dtype=jnp.float32)

    # Deterministic nn.Linear-style init: U(-1/sqrt(in), 1/sqrt(in)), W:(out,in)
    bound = 1.0 / math.sqrt(n_embed)
    w_key = jax.random.uniform(kk, (head_size, n_embed), jnp.float32, -bound, bound)
    w_query = jax.random.uniform(kq, (head_size, n_embed), jnp.float32, -bound, bound)
    w_value = jax.random.uniform(kv, (head_size, n_embed), jnp.float32, -bound, bound)

    out = head_forward(x, w_key, w_query, w_value, block_q=8, block_kv=8)
    out = jax.block_until_ready(out)

    ref = reference_forward(x, w_key, w_query, w_value)
    assert out.shape == (B, T, head_size)
    # Tolerance accounts for the EUP approximate reciprocal in the final
    # softmax normalization (well below any real-bug error scale).
    assert jnp.allclose(out, ref, atol=5e-3, rtol=5e-3), "mismatch vs reference"

    print("KERNEL_OK")
</pallas_src>

<mosaic_0001>
module attributes {stable_mosaic.version = 11 : i64} {
  func.func @qkv_proj_kernel(%arg0: i32, %arg1: i32, %arg2: memref<1x8x32xf32, #tpu.memory_space<vmem>>, %arg3: memref<32x384xf32, #tpu.memory_space<vmem>>, %arg4: memref<1x8x128xf32, #tpu.memory_space<vmem>>, %arg5: memref<1x8x128xf32, #tpu.memory_space<vmem>>, %arg6: memref<1x8x128xf32, #tpu.memory_space<vmem>>) attributes {dimension_semantics = [#tpu.dimension_semantics<parallel>, #tpu.dimension_semantics<parallel>], iteration_bounds = array<i64: 2, 2>, scalar_prefetch = 0 : i64, scratch_operands = 0 : i64, tpu.core_type = #tpu.core_type<tc>, window_params = [{transform_indices = @transform_0, window_bounds = array<i64: 1, 8, 32>}, {pipeline_mode = #tpu.pipeline_mode<synchronous>, transform_indices = @transform_1, window_bounds = array<i64: 32, 384>}, {transform_indices = @transform_2, window_bounds = array<i64: 1, 8, 128>}, {transform_indices = @transform_3, window_bounds = array<i64: 1, 8, 128>}, {transform_indices = @transform_4, window_bounds = array<i64: 1, 8, 128>}]} {
    %c0 = arith.constant 0 : index
    %c0_0 = arith.constant 0 : index
    %c0_1 = arith.constant 0 : index
    %0 = vector.load %arg2[%c0, %c0_0, %c0_1] : memref<1x8x32xf32, #tpu.memory_space<vmem>>, vector<1x8x32xf32>
    %1 = vector.shape_cast %0 : vector<1x8x32xf32> to vector<8x32xf32>
    %c0_2 = arith.constant 0 : index
    %c0_3 = arith.constant 0 : index
    %2 = vector.load %arg3[%c0_2, %c0_3] : memref<32x384xf32, #tpu.memory_space<vmem>>, vector<32x384xf32>
    %cst = arith.constant dense<0.000000e+00> : vector<8x384xf32>
    %3 = tpu.matmul %1, %2, %cst {dimension_numbers = #tpu.dot_dimension_numbers<[1], [0], [0], [1], [0, 0, 1, 1], [], []>} : vector<8x32xf32>, vector<32x384xf32>, vector<8x384xf32> -> vector<8x384xf32>
    %4 = vector.extract_strided_slice %3 {offsets = [0, 0], sizes = [8, 128], strides = [1, 1]} : vector<8x384xf32> to vector<8x128xf32>
    %cst_4 = arith.constant 0.176776692 : f32
    %5 = vector.broadcast %cst_4 : f32 to vector<8x128xf32>
    %6 = arith.mulf %4, %5 : vector<8x128xf32>
    %c0_5 = arith.constant 0 : index
    %c0_6 = arith.constant 0 : index
    %c0_7 = arith.constant 0 : index
    %7 = vector.load %arg4[%c0_5, %c0_6, %c0_7] : memref<1x8x128xf32, #tpu.memory_space<vmem>>, vector<1x8x128xf32>
    %8 = vector.shape_cast %7 : vector<1x8x128xf32> to vector<8x128xf32>
    %9 = vector.shape_cast %6 : vector<8x128xf32> to vector<1x8x128xf32>
    tpu.vector_store %arg4[%c0_5, %c0_6, %c0_7], %9 {strides = array<i32>} : memref<1x8x128xf32, #tpu.memory_space<vmem>>, vector<1x8x128xf32>,
    %10 = vector.extract_strided_slice %3 {offsets = [0, 128], sizes = [8, 128], strides = [1, 1]} : vector<8x384xf32> to vector<8x128xf32>
    %c0_8 = arith.constant 0 : index
    %c0_9 = arith.constant 0 : index
    %c0_10 = arith.constant 0 : index
    %11 = vector.load %arg5[%c0_8, %c0_9, %c0_10] : memref<1x8x128xf32, #tpu.memory_space<vmem>>, vector<1x8x128xf32>
    %12 = vector.shape_cast %11 : vector<1x8x128xf32> to vector<8x128xf32>
    %13 = vector.shape_cast %10 : vector<8x128xf32> to vector<1x8x128xf32>
    tpu.vector_store %arg5[%c0_8, %c0_9, %c0_10], %13 {strides = array<i32>} : memref<1x8x128xf32, #tpu.memory_space<vmem>>, vector<1x8x128xf32>,
    %14 = vector.extract_strided_slice %3 {offsets = [0, 256], sizes = [8, 128], strides = [1, 1]} : vector<8x384xf32> to vector<8x128xf32>
    %c0_11 = arith.constant 0 : index
    %c0_12 = arith.constant 0 : index
    %c0_13 = arith.constant 0 : index
    %15 = vector.load %arg6[%c0_11, %c0_12, %c0_13] : memref<1x8x128xf32, #tpu.memory_space<vmem>>, vector<1x8x128xf32>
    %16 = vector.shape_cast %15 : vector<1x8x128xf32> to vector<8x128xf32>
    %17 = vector.shape_cast %14 : vector<8x128xf32> to vector<1x8x128xf32>
    tpu.vector_store %arg6[%c0_11, %c0_12, %c0_13], %17 {strides = array<i32>} : memref<1x8x128xf32, #tpu.memory_space<vmem>>, vector<1x8x128xf32>,
    return
  }
  func.func @transform_0(%arg0: i32, %arg1: i32) -> (i32, i32, i32) {
    %c0_i32 = arith.constant 0 : i32
    %c0_i32_0 = arith.constant 0 : i32
    return %arg0, %arg1, %c0_i32 : i32, i32, i32
  }
  func.func @transform_1(%arg0: i32, %arg1: i32) -> (i32, i32) {
    %c0_i32 = arith.constant 0 : i32
    %c0_i32_0 = arith.constant 0 : i32
    %c0_i32_1 = arith.constant 0 : i32
    return %c0_i32, %c0_i32_0 : i32, i32
  }
  func.func @transform_2(%arg0: i32, %arg1: i32) -> (i32, i32, i32) {
    %c0_i32 = arith.constant 0 : i32
    %c0_i32_0 = arith.constant 0 : i32
    return %arg0, %arg1, %c0_i32 : i32, i32, i32
  }
  func.func @transform_3(%arg0: i32, %arg1: i32) -> (i32, i32, i32) {
    %c0_i32 = arith.constant 0 : i32
    %c0_i32_0 = arith.constant 0 : i32
    return %arg0, %arg1, %c0_i32 : i32, i32, i32
  }
  func.func @transform_4(%arg0: i32, %arg1: i32) -> (i32, i32, i32) {
    %c0_i32 = arith.constant 0 : i32
    %c0_i32_0 = arith.constant 0 : i32
    return %arg0, %arg1, %c0_i32 : i32, i32, i32
  }
}

</mosaic_0001>

<bundles_post_ra>
// kernel: tpu_custom_call.1
= control target key start
LH: loop header
LB: loop body
LE: loop exit
PB: predicated region body
PF: predicated region fallthrough
CT: control target
= control target key end

     0   :  { %s1198_s0 = inlined_call_operand.hbm [shape: f32[2,16,32], index: 0, kind: input, shape index: {}]   ;;  %s1199_s1 = inlined_call_operand.hbm [shape: f32[32,384], index: 1, kind: input, shape index: {}]   ;;  %s1200_s2 = inlined_call_operand.hbm [shape: f32[2,16,128], index: 2, kind: output, shape index: {0}]   ;;  %s1201_s3 = inlined_call_operand.hbm [shape: f32[2,16,128], index: 3, kind: output, shape index: {1}]   ;;  %s1202_s4 = inlined_call_operand.hbm [shape: f32[2,16,128], index: 4, kind: output, shape index: {2}]  }
   0x1   :  { %1211 = sst [smem:[#allocation20_spill]] %s1199_s1 }
   0x2   :  { %10 = vsyncpa [#allocation3], 0 }
   0x3   :  { %12 = vsyncpa [#allocation3 + $0x1], 0 }
   0x4   :  { %13 = vsyncpa [#allocation6], 0 }
   0x5   :  { %14 = vsyncpa [#allocation4], 0 }
   0x6   :  { %16 = vsyncpa [#allocation4 + $0x1], 0 }
   0x7   :  { %17 = vsyncpa [#allocation9], 0 }
   0x8   :  { %19 = vsyncpa [#allocation9 + $0x1], 0  ;;  %s956_s15 = smov 0   ;;  %s958_s16 = smov 0  }
   0x9   :  { %s960_s17 = smov 0   ;;  %s962_s18 = smov 0  }
   0xa   :  { %s964_s19 = smov 0   ;;  %s966_s20 = smov 0  }
   0xb   :  { %s968_s21 = smov 0   ;;  %s970_s22 = smov 0  }
   0xc LB: > { %1212 = sst [smem:[#allocation15_spill]] %s898_s15  ;;  %s997_s23 = sadd.s32 4294967295, %s926_s22   ;;  %s926_s22 = sphi %s970_s22, %s25_s22   ;;  %s922_s21 = sphi %s968_s21, %s1236_s21   ;;  %s918_s20 = sphi %s966_s20, %s1235_s20   ;;  %s914_s19 = sphi %s964_s19, %s1234_s19   ;;  %s910_s18 = sphi %s962_s18, %s1233_s18   ;;  %s906_s17 = sphi %s960_s17, %s1232_s17   ;;  %s902_s16 = sphi %s958_s16, %s1231_s16   ;;  %s898_s15 = sphi %s956_s15, %s1230_s15  }
   0xd   : > { %p577_p0 = scmp.ge.s32.totalorder %s926_s22, 1  ;;  %p60_p1 = scmp.eq.s32.totalorder %s997_s23, 0 }
   0xe   : > { %p175_p2 = scmp.lt.s32.totalorder %s926_s22, 5  ;;  %s1213_s1 = sld [smem:[#allocation20_spill]] }
   0xf   : > { %s928_s28 = smov [#allocation5]   ;;  %s929_s30 = smov 384  }
  0x10   : > { %p1005_p3 = pnand %p577_p0, %p175_p2  ;;  %s188_s29 = sshll.u32 %s928_s28, 4  ;;  %s189_s29 = int_to_ptr.vmem [resolvable:$true] %s188_s29 }
  0x11   : > { %s930_s5 = smov 24   ;;  %s1203_s6 = sadd.s32 4294967294, %s926_s22  }
  0x12   : > { %p615_p4 = pneg %p1005_p3  ;;  %s34_s7 = sadd.s32 1, %s918_s20 }
  0x13   : > { %s37_s8 = sadd.s32 1, %s922_s21  ;;  %p35_p6 = scmp.ge.s32.totalorder %s34_s7, 2 }
  0x14   : > { %s186_s26 = sshll.u32 %s1213_s1, 4  ;;  %p616_p5 = pnand %p615_p4, %p60_p1  ;;  %s187_s26 = int_to_ptr.hbm [resolvable:$true] %s186_s26 }
  0x15   : > { %s46_s9 = sadd.s32 1, %s906_s17  ;;  %p53_p7 = scmp.ne.s32.totalorder %s906_s17, %s902_s16 }
  0x16   : > { %618 = dma.hbm_to_vmem [thread:$0]  (!%p616_p5), %s187_s26, 1536, %s189_s29, [#allocation6], %s929_s30, %s929_s30, %s930_s5  }
  0x17   : > { %p54_p8 = scmp.eq.s32.totalorder %s926_s22, 0  ;;  %s1238_s7 = smov (%p35_p6, %s34_s7), 0 }
  0x18   : > { %1215 = sst [smem:[#allocation16_spill]] %s1238_s7  ;;  %s1240_s8 = smov (!%p35_p6, %s37_s8), %s922_s21 }
  0x19   : > { %s42_s10 = ssub.s32 %s918_s20, %s1238_s7  ;;  %p1025_p9 = por %p54_p8, %p53_p7 }
  0x1a   : > { %p39_p10 = scmp.ge.s32.totalorder %s1240_s8, 2  ;;  %p59_p11 = scmp.ne.s32.totalorder %s902_s16, %s898_s15 }
  0x1b   : > { %p106_p12 = scmp.eq.s32.totalorder %s997_s23, 3  ;;  %p112_p13 = scmp.eq.s32.totalorder %s1203_s6, 3 }
  0x1c   : > { %s1242_s8 = smov (%p39_p10, %s1240_s8), 0  ;;  %p1038_p0 = por %p60_p1, %p59_p11 }
  0x1d   : > { %1217 = sst [smem:[#allocation17_spill]] %s1242_s8  ;;  %p1042_p2 = por %p106_p12, %p53_p7 }
  0x1e   : > { %s41_s14 = ssub.s32 %s922_s21, %s1242_s8  ;;  %p1048_p4 = por %p112_p13, %p59_p11 }
  0x1f   : > { %s1219_s13 = scalar_select %p1042_p2, 1, 0 }
  0x20   : > { %s1221_s24 = scalar_select %p1048_p4, 1, 0 }
  0x21   : > { %1220 = sst [smem:[#allocation18_spill]] %s1219_s13  ;;  %s43_s25 = sor.u32 %s42_s10, %s41_s14 }
  0x22   : > { %1222 = sst [smem:[#allocation19_spill]] %s1221_s24  ;;  %p634_p5 = scmp.lt.s32.totalorder %s926_s22, 4 }
  0x23   : > { %p44_p6 = scmp.eq.s32.totalorder %s43_s25, 0  ;;  %s202_s26 = sand.u32 1, %s906_s17  }
  0x24   : > { %s580_s28 = sshll.u32 %s202_s26, 3  ;;  %s581_s30 = sshll.u32 %s922_s21, 1 }
  0x25   : > { %s1055_s29 = scalar_select %p44_p6, %s906_s17, %s46_s9  }
  0x26   : > { %s210_s5 = sadd.s32 %s918_s20, %s581_s30  ;;  %s206_s6 = scalar_lea.vmem [#allocation2], %s580_s28 }
  0x27   : > { %s216_s1 = sshll.u32 %s206_s6, 4  ;;  %s582_s7 = sshll.u32 %s210_s5, 3  ;;  %s217_s1 = int_to_ptr.vmem [resolvable:$true] %s216_s1 }
  0x28   : > { %s212_s8 = scalar_lea.hbm %s1198_s0, %s582_s7  ;;  %p620_p7 = pnand %p634_p5, %p1025_p9 }
  0x29   : > { %s214_s24 = sshll.u32 %s212_s8, 4  ;;  %s203_s10 = scalar_lea.sflag [#allocation3], %s202_s26  ;;  %s215_s24 = int_to_ptr.hbm [resolvable:$true] %s214_s24 }
  0x2a   : > { %622 = dma.hbm_to_vmem [thread:$0]  (!%p620_p7), %s215_s24, 128, %s217_s1, %s203_s10  }
  0x2b   : > { %225 = sbr.rel (%p1005_p3) target bundleno = 215 (0xd7), region = 28  ;;  %s1067_s9 = sand.u32 (!%p1005_p3), 1, %s902_s16  }
  0x2c   : > { %s1070_s6 = sshll.u32 (!%p1005_p3), %s1067_s9, 3  ;;  %s228_s15 = scalar_lea.sflag (!%p1005_p3), [#allocation3], %s1067_s9 }
  0x2d   : > { %s231_s7 = scalar_lea.vmem (!%p1005_p3), [#allocation2], %s1070_s6 }
  0x30   : > { %881 = dma.done.wait (%p1038_p0), %s228_s15, 128  }
  0x31   : > { %883 = vsyncadd (%p1038_p0), %s228_s15, 4294967168 }
  0x32   : > { %885 = dma.done.wait (%p60_p1), [#allocation6], 1536  }
  0x33   : > { %887 = vsyncadd (%p60_p1), [#allocation6], 4294965760  ;;  %v284_v0 = vld [vmem:[#allocation5 + $0x58] sm:$0xff]  ;;  %v281_v1 = vld [vmem:[#allocation5 + $0x40] sm:$0xff]  ;;  %vm285_vm0 = vcmask 261120   ;;  %s595_s1 = sshll.u32 %s914_s19, 1 }
  0x34   : > { %v282_v2 = vld [vmem:[#allocation5 + $0x48] sm:$0xff]  ;;  %341 = vmatpush.msra.mxu2 %v284_v0  ;;  %v283_v3 = vld [vmem:[#allocation5 + $0x50] sm:$0xff]  ;;  %v280_v6 = vld [vmem:[#allocation5 + $0x38] sm:$0xff]  ;;  %s374_s27 = sadd.s32 %s910_s18, %s595_s1  ;;  %s264_s11 = scalar_lea.vmem [#allocation8], %s1070_s6 }
  0x35   : > { %301 = vmatpush.msra.mxu0 %v282_v2  ;;  %v279_v4 = vld [vmem:[#allocation5 + $0x30] sm:$0xff]  ;;  %v278_v5 = vld [vmem:[#allocation5 + $0x28] sm:$0xff]  ;;  %321 = vmatpush.msra.mxu1 %v283_v3  ;;  %v276_v7 = vld [vmem:[#allocation5 + $0x18] sm:$0xff]  ;;  %s596_s8 = sshll.u32 %s374_s27, 3  ;;  %s1085_s12 = sshll.u32 %s264_s11, 4  ;;  %s395_s12 = int_to_ptr.vmem [resolvable:$true] %s1085_s12 }
  0x36   : > { %342 = vmatpush.msra.mxu2 %v281_v1  ;;  %v277_v8 = vld [vmem:[#allocation5 + $0x20] sm:$0xff]  ;;  %v275_v9 = vld [vmem:[#allocation5 + $0x10] sm:$0xff]  ;;  %v274_v12 = vld [vmem:[#allocation5 + $0x8] sm:$0xff]  ;;  %s376_s24 = scalar_lea.hbm %s1200_s2, %s596_s8  ;;  %s392_s28 = scalar_lea.hbm %s1201_s3, %s596_s8 }
  0x37   : > { %302 = vmatpush.msra.mxu0 %v279_v4  ;;  %322 = vmatpush.msra.mxu1 %v280_v6  ;;  %v273_v10 = vld [vmem:[#allocation5] sm:$0xff]  ;;  %v272_v11 = vld [vmem:[%s231_s7] sm:$0xff]  ;;  %s358_s30 = sand.u32 1, %s997_s23   ;;  %s408_s19 = scalar_lea.hbm %s1202_s4, %s596_s8 }
  0x38   : > { %343 = vmatpush.msra.mxu2 %v278_v5  ;;  %s257_s18 = scalar_lea.vmem [#allocation7], %s1070_s6  ;;  %s1101_s7 = sshll.u32 %s376_s24, 4  ;;  %s381_s7 = int_to_ptr.hbm [resolvable:$true] %s1101_s7 }
  0x39   : > { %303 = vmatpush.msra.mxu0 %v276_v7  ;;  %323 = vmatpush.msra.mxu1 %v277_v8  ;;  %s1099_s15 = sshll.u32 %s257_s18, 4  ;;  %s1210_s1 = scalar_lea.vmem [#allocation10], %s1070_s6  ;;  %s379_s15 = int_to_ptr.vmem [resolvable:$true] %s1099_s15 }
  0x3a   : > { %344 = vmatpush.msra.mxu2 %v275_v9  ;;  %s1106_s27 = sshll.u32 %s1210_s1, 4  ;;  %s1108_s13 = sshll.u32 %s392_s28, 4  ;;  %s397_s13 = int_to_ptr.hbm [resolvable:$true] %s1108_s13  ;;  %s411_s27 = int_to_ptr.vmem [resolvable:$true] %s1106_s27 }
  0x3b   : > { %304 = vmatpush.msra.mxu0 %v273_v10  ;;  %591 = vmatmul.msk.f32.vlgmr.msra.gmra.mxu2 %vm285_vm0, %v272_v11  ;;  %s1110_s25 = sshll.u32 %s408_s19, 4  ;;  %s354_s8 = scalar_lea.sflag [#allocation4], %s1067_s9  ;;  %s413_s25 = int_to_ptr.hbm [resolvable:$true] %s1110_s25 }
  0x3c   : > { %589 = vmatmul.msk.f32.vlgmr.msra.gmra.mxu0 %vm285_vm0, %v272_v11  ;;  %324 = vmatpush.msra.mxu1 %v274_v12  ;;  %s778_s24 = sshra.s32 %s381_s7, 4  ;;  %s784_s10 = scalar_lea.hbm %s1200_s2, 32  ;;  %s779_s24 = int_to_ptr.hbm [resolvable:$true] %s778_s24 }
  0x3d   : > { %590 = vmatmul.msk.f32.vlgmr.msra.gmra.mxu1 %vm285_vm0, %v272_v11  ;;  %s780_s26 = scalar_lea.hbm %s779_s24, 8  ;;  %p785_p9 = scmp.lt.s32.totalorder %s779_s24, %s1200_s2 }
  0x3e   : > { %p781_p1 = scmp.ne.s32.totalorder %s779_s24, %s780_s26  ;;  %p786_p10 = scmp.lt.s32.totalorder %s784_s10, %s780_s26 }
  0x40   : > { %p782_p3 = pnand %p781_p1, %p1042_p2  ;;  %p787_p11 = por %p786_p10, %p785_p9 }
  0x42   : > { %p783_p8 = pneg %p782_p3 }
  0x44   : > { %p788_p12 = pnand %p787_p11, %p783_p8 }
  0xb9   : > { %v306_v13 = vpop.f32.mrf.mxu0 }
  0xba   : > { %v349_v14 = vmul.f32 0.17677669, %v306_v13  ;;  %v326_v15 = vpop.f32.mrf.mxu1 }
  0xbb   : > { %351 = vst [vmem:[%s264_s11] sm:$0xff] %v326_v15 }
  0xbc   : > { %350 = vst [vmem:[%s257_s18] sm:$0xff] %v349_v14 }
  0xbd   : > { %791 = shalt.err (!%p788_p12)
}
  0xbe   : > { %609 = dma.vmem_to_hbm [thread:$0]  (%p1042_p2), %s379_s15, 128, %s381_s7, %s354_s8  }
  0xbf   : > { %s1130_s9 = scalar_lea.sflag [#allocation9], %s358_s30  ;;  %s806_s11 = sshra.s32 %s397_s13, 4  ;;  %s807_s11 = int_to_ptr.hbm [resolvable:$true] %s806_s11 }
  0xc0   : > { %s808_s18 = scalar_lea.hbm %s807_s11, 8  ;;  %s812_s26 = scalar_lea.hbm %s1201_s3, 32 }
  0xc1   : > { %p809_p13 = scmp.ne.s32.totalorder %s807_s11, %s808_s18  ;;  %p813_p6 = scmp.lt.s32.totalorder %s807_s11, %s1201_s3 }
  0xc2   : > { %p814_p7 = scmp.lt.s32.totalorder %s812_s26, %s808_s18 }
  0xc3   : > { %p810_p0 = pnand %p809_p13, %p1042_p2 }
  0xc4   : > { %p815_p1 = por %p814_p7, %p813_p6 }
  0xc5   : > { %p811_p5 = pneg %p810_p0 }
  0xc7   : > { %p816_p3 = pnand %p815_p1, %p811_p5 }
  0xc9   : > { %819 = shalt.err (!%p816_p3)
}
  0xca   : > { %610 = dma.vmem_to_hbm [thread:$0]  (%p1042_p2), %s395_s12, 128, %s397_s13, %s1130_s9   ;;  %v346_v16 = vpop.f32.mrf.mxu2 }
  0xcb   : > { %s1224_s23 = scalar_lea.vmem [#allocation10], %s1070_s6  ;;  %s834_s30 = sshra.s32 %s413_s25, 4  ;;  %s835_s30 = int_to_ptr.hbm [resolvable:$true] %s834_s30 }
  0xcc   : > { %352 = vst [vmem:[%s1224_s23] sm:$0xff] %v346_v16  ;;  %s836_s15 = scalar_lea.hbm %s835_s30, 8  ;;  %s840_s10 = scalar_lea.hbm %s1202_s4, 32 }
  0xcd   : > { %p837_p8 = scmp.ne.s32.totalorder %s835_s30, %s836_s15  ;;  %p841_p11 = scmp.lt.s32.totalorder %s835_s30, %s1202_s4 }
  0xce   : > { %p842_p12 = scmp.lt.s32.totalorder %s840_s10, %s836_s15 }
  0xcf   : > { %p838_p9 = pnand %p837_p8, %p1042_p2 }
  0xd0   : > { %p843_p13 = por %p842_p12, %p841_p11 }
  0xd1   : > { %p839_p10 = pneg %p838_p9 }
  0xd3   : > { %p844_p0 = pnand %p843_p13, %p839_p10 }
  0xd5   : > { %847 = shalt.err (!%p844_p0)
}
  0xd6   : > { %611 = dma.vmem_to_hbm [thread:$0]  (%p1042_p2), %s411_s27, 128, %s413_s25, %s1130_s9  }
  0xd7 PF: > { %s1225_s6 = sld [smem:[#allocation15_spill]]  ;;  %p636_p5 = scmp.ge.s32.totalorder %s926_s22, 2 }
  0xd9   : > { %p624_p6 = pnand %p636_p5, %p1048_p4 }
  0xdb   : > { %p625_p7 = pneg %p624_p6 }
  0xdd   : > { %s424_s13 = sand.u32 1, %s1225_s6  }
  0xde   : > { %s425_s18 = scalar_lea.sflag [#allocation4], %s424_s13 }
  0xdf   : > { %889 = dma.done.wait (%p625_p7), %s425_s18, 128  }
  0xe0   : > { %891 = vsyncadd (%p625_p7), %s425_s18, 4294967168  ;;  %s1227_s14 = sadd.s32 4294967294, %s926_s22  }
  0xe1   : > { %s434_s1 = sand.u32 1, %s1227_s14  }
  0xe2   : > { %s435_s24 = scalar_lea.sflag [#allocation9], %s434_s1 }
  0xe3   : > { %893 = dma.done.wait (%p625_p7), %s435_s24, 256  }
  0xe4   : > { %895 = vsyncadd (%p625_p7), %s435_s24, 4294967040  ;;  %s25_s22 = sadd.s32 1, %s926_s22   ;;  %s1228_s27 = sld [smem:[#allocation16_spill]] }
  0xe5   : > { %p22_p2 = scmp.ge.s32.totalorder %s25_s22, 6   ;;  %s1229_s25 = sld [smem:[#allocation17_spill]] }
  0xe6   : > { %s1230_s15 = smov %s902_s16  ;;  %s1231_s16 = smov %s906_s17 }
  0xe7   : > { %s1232_s17 = smov %s1055_s29  ;;  %s1233_s18 = smov %s918_s20 }
  0xe8   : > { %s1234_s19 = smov %s922_s21  ;;  %24 = sbr.rel (!%p22_p2) target bundleno = 12 (0xc), region = 109 }
  0xea   : > { %s1235_s20 = smov %s1228_s27 }
  0xeb   : > { %s1236_s21 = smov %s1229_s25 }
  0xed   :  { %451 = vsyncpa [#allocation3], 1 }
  0xee   :  { %453 = vsyncpa [#allocation3 + $0x1], 1 }
  0xef   :  { %454 = vsyncpa [#allocation6], 1 }
  0xf0   :  { %455 = vsyncpa [#allocation4], 1 }
  0xf1   :  { %457 = vsyncpa [#allocation4 + $0x1], 1 }
  0xf2   :  { %458 = vsyncpa [#allocation9], 1 }
  0xf3   :  { %460 = vsyncpa [#allocation9 + $0x1], 1 }

</bundles_post_ra>
